<compile_context>
chip_gen: v7x
topology: tpu7x:2x2x1
jax: 0.10.0
libtpu: 0.0.40
codegen_flags: <defaults>
</compile_context>

<pallas_src>
import functools

import jax
import jax.numpy as jnp
from jax.experimental import pallas as pl
from jax.experimental.pallas import tpu as pltpu

_NEG_BIG = -1e30  # finite "minus infinity" (avoids inf-inf NaNs in the online softmax)


def _round_up(n, m):
    return ((n + m - 1) // m) * m


# --------------------------------------------------------------------------------------
# whole-T kernels (one grid axis over batch; the full time axis lives in the block)
# --------------------------------------------------------------------------------------
def _softmax_pool(x, scores):
    """x: (bt, T, D) native dtype; scores: (bt, T, 1) f32 -> (bt, D) f32 pooled."""
    m = jnp.max(scores, axis=1, keepdims=True)                  # (bt, 1, 1)
    e = jnp.exp(scores - m)                                     # (bt, T, 1)
    denom = jnp.sum(e, axis=1, keepdims=True)                   # (bt, 1, 1)
    distr = e / denom                                           # exact softmax over time
    # torch: bmm(x.transpose(2,1), distr)[:, :, 0] == sum_t distr[b,t] * x[b,t,:]
    return jnp.sum(x.astype(jnp.float32) * distr, axis=1)       # (bt, D) f32 accumulation


def _kernel_location(x_ref, wq_ref, bq_ref, o_ref):
    x = x_ref[...]                                              # (bt, T, D)
    # CustomTD(D, 1): VPU broadcast-multiply + lane reduce (no degenerate N=1 matmul)
    s = jnp.sum(x.astype(jnp.float32) * wq_ref[...], axis=-1, keepdims=True) + bq_ref[...]
    o_ref[...] = _softmax_pool(x, s).astype(o_ref.dtype)


def _kernel_ienco(x_ref, wk_ref, bk_ref, wq_ref, o_ref):
    x = x_ref[...]                                              # (bt, T, D)
    bt, t, d = x.shape
    # D -> key_dim projection on the MXU (2-D view of the block; clean when T % 8 == 0)
    k = jnp.dot(x.reshape(bt * t, d), wk_ref[...],
                preferred_element_type=jnp.float32).reshape(bt, t, -1)
    k = jnp.tanh(k + bk_ref[...])
    # CustomTD(key_dim, 1, bias=False): broadcast-multiply + lane reduce
    s = jnp.sum(k * wq_ref[...], axis=-1, keepdims=True)        # (bt, T, 1)
    o_ref[...] = _softmax_pool(x, s).astype(o_ref.dtype)


def _kernel_self_query(x_ref, wk_ref, bk_ref, wq_ref, bq_t_ref, o_ref):
    x = x_ref[...]                                              # (bt, T, D)
    bt, t, d = x.shape
    # linearity: q = sum_t (x[b,t] @ wq^T + bq) = (sum_t x[b,t]) @ wq^T + T*bq
    xsum = jnp.sum(x.astype(jnp.float32), axis=1)               # (bt, D)
    q = jnp.dot(xsum, wq_ref[...], preferred_element_type=jnp.float32) + bq_t_ref[...]
    k = jnp.dot(x.reshape(bt * t, d), wk_ref[...],
                preferred_element_type=jnp.float32).reshape(bt, t, -1) + bk_ref[...]
    s = jnp.sum(k * q[:, None, :], axis=-1, keepdims=True)      # (bt, T, 1) == bmm(k, q^T)
    o_ref[...] = _softmax_pool(x, s).astype(o_ref.dtype)


# --------------------------------------------------------------------------------------
# long-T fallback kernels: time-tiled online softmax (flash-style accumulators)
# --------------------------------------------------------------------------------------
def _time_block(x_ref, t_idx, t_total, t_tile):
    """Load the (bt, tt, D) block; zero timesteps past the true length and return a
    (1, tt, 1) validity mask (None when t_tile divides T)."""
    x = x_ref[...]
    if t_total % t_tile == 0:
        return x, None
    tids = t_idx * t_tile + jax.lax.broadcasted_iota(jnp.int32, (1, t_tile, 1), 1)
    valid = tids < t_total
    return jnp.where(valid, x, jnp.zeros_like(x)), valid


def _online_softmax_update(x, s, valid, t_idx, o_ref, m_ref, l_ref, acc_ref):
    """s: (bt, tt, 1) f32 scores for this time block."""
    if valid is not None:
        s = jnp.where(valid, s, _NEG_BIG)

    @pl.when(t_idx == 0)
    def _():
        m_ref[...] = jnp.full_like(m_ref, _NEG_BIG)
        l_ref[...] = jnp.zeros_like(l_ref)
        acc_ref[...] = jnp.zeros_like(acc_ref)

    m_prev = m_ref[...]                                         # (bt, 1, 1)
    m_new = jnp.maximum(m_prev, jnp.max(s, axis=1, keepdims=True))
    alpha = jnp.exp(m_prev - m_new)                             # (bt, 1, 1)
    p = jnp.exp(s - m_new)                                      # (bt, tt, 1)
    l_ref[...] = alpha * l_ref[...] + jnp.sum(p, axis=1, keepdims=True)
    acc_ref[...] = alpha * acc_ref[...] + jnp.sum(p * x.astype(jnp.float32),
                                                  axis=1, keepdims=True)
    m_ref[...] = m_new

    @pl.when(t_idx == pl.num_programs(1) - 1)
    def _():
        o_ref[...] = (acc_ref[...] / l_ref[...]).astype(o_ref.dtype)


def _tiled_location(x_ref, wq_ref, bq_ref, o_ref, m_ref, l_ref, acc_ref, *,
                    t_total, t_tile):
    t_idx = pl.program_id(1)
    x, valid = _time_block(x_ref, t_idx, t_total, t_tile)
    s = jnp.sum(x.astype(jnp.float32) * wq_ref[...], axis=-1, keepdims=True) + bq_ref[...]
    _online_softmax_update(x, s, valid, t_idx, o_ref, m_ref, l_ref, acc_ref)


def _tiled_ienco(x_ref, wk_ref, bk_ref, wq_ref, o_ref, m_ref, l_ref, acc_ref, *,
                 t_total, t_tile):
    t_idx = pl.program_id(1)
    x, valid = _time_block(x_ref, t_idx, t_total, t_tile)
    bt, tt, d = x.shape
    k = jnp.dot(x.reshape(bt * tt, d), wk_ref[...],
                preferred_element_type=jnp.float32).reshape(bt, tt, -1)
    k = jnp.tanh(k + bk_ref[...])
    s = jnp.sum(k * wq_ref[...], axis=-1, keepdims=True)
    _online_softmax_update(x, s, valid, t_idx, o_ref, m_ref, l_ref, acc_ref)


def _tiled_self_query(x_ref, q_ref, wk_ref, bk_ref, o_ref, m_ref, l_ref, acc_ref, *,
                      t_total, t_tile):
    t_idx = pl.program_id(1)
    x, valid = _time_block(x_ref, t_idx, t_total, t_tile)
    bt, tt, d = x.shape
    k = jnp.dot(x.reshape(bt * tt, d), wk_ref[...],
                preferred_element_type=jnp.float32).reshape(bt, tt, -1) + bk_ref[...]
    s = jnp.sum(k * q_ref[...], axis=-1, keepdims=True)         # q block is (bt, 1, h)
    _online_softmax_update(x, s, valid, t_idx, o_ref, m_ref, l_ref, acc_ref)


# --------------------------------------------------------------------------------------
# tiling / VMEM planning
# --------------------------------------------------------------------------------------
def _vmem_plan():
    """(tile budget, vmem_limit_bytes), safe on v5e/v6e (128 MiB) and v7x (64 MiB)."""
    cap = 64 << 20
    try:
        info = pltpu.get_tpu_info()
        cap = int(getattr(info, "vmem_capacity_bytes", cap)) or cap
    except Exception:
        pass
    limit = max(32 << 20, min(cap - (16 << 20), 100 << 20))
    budget = min(limit // 2, 24 << 20)
    return budget, int(limit)


def _plan_tiles(B, T, D, itemsize, proj_cols, budget):
    """Pick (batch_tile, time_tile).  time_tile == T -> whole time axis per block."""
    d_pad = _round_up(max(D, 1), 128)                 # VMEM lane padding of the last dim
    p_pad = _round_up(max(proj_cols, 1), 128) if proj_cols else 0

    def per_row(tt):
        b = 2 * tt * d_pad * itemsize                 # double-buffered x block
        b += tt * d_pad * 4                           # f32 temporaries over the x block
        if proj_cols:
            b += tt * p_pad * 4                       # projected keys (f32)
            b += tt * d_pad * itemsize                # possible relayout copy for 2-D view
        b += 4 * d_pad * 4                            # output double-buffer + f32 accumulator
        return b

    min_rows = min(B, 8)
    if min_rows * per_row(T) <= budget:
        tt = T
    else:
        unit = max(per_row(1) - per_row(0), 1)
        tt = (budget // max(min_rows, 1) - per_row(0)) // unit
        tt = max(16, (tt // 16) * 16)                 # sublane-clean 2-D matmul views
        tt = min(tt, T)

    rows = max(budget // per_row(tt), 1)
    if B <= 8:
        bt = B                                        # full-extent batch block
    else:
        bt = max(8, (min(rows, B) // 8) * 8)
        # keep >= ~8 grid steps over batch when B allows: hides the input DMA behind
        # compute and gives each v7x TensorCore >= 4 steps.
        target_steps = min(8, B // 8)
        if target_steps >= 2:
            bt = min(bt, max(8, (B // target_steps) // 8 * 8))
    return bt, tt


def _const_spec(shape, n_grid):
    zeros = (0,) * len(shape)
    if n_grid == 1:
        return pl.BlockSpec(shape, lambda b: zeros)
    return pl.BlockSpec(shape, lambda b, t: zeros)


# --------------------------------------------------------------------------------------
# wrapper
# --------------------------------------------------------------------------------------
def temporal_attention_pooling(x, params, mode="location", *, tile_override=None):
    """x: (B, T, D) -> (B, D), matching TemporalAttentionPooling.forward.
    tile_override=(bt, tt) is for testing only (tt must be a multiple of 8 or == T)."""
    B, T, D = x.shape
    f32 = jnp.float32
    itemsize = jnp.dtype(x.dtype).itemsize

    if mode == "location":
        proj_cols = 0
    elif mode in ("ienco", "self-query"):
        proj_cols = params["wk"].shape[0]
    else:
        raise ValueError(mode)

    budget, vmem_limit = _vmem_plan()
    budget = max(budget - 16 * D * max(proj_cols, 1) - (64 << 10), budget // 2)
    if tile_override is not None:
        bt, tt = tile_override
    else:
        bt, tt = _plan_tiles(B, T, D, itemsize, proj_cols, budget)

    nb = pl.cdiv(B, bt)

    if tt >= T:
        # -------- whole time axis resident per block --------
        if mode == "location":
            kernel = _kernel_location
            weights = (params["wq"].astype(f32).reshape(1, D),
                       params["bq"].astype(f32).reshape(1, 1))
        elif mode == "ienco":
            kernel = _kernel_ienco
            weights = (params["wk"].T.astype(x.dtype),             # (D, key_dim)
                       params["bk"].astype(f32).reshape(1, -1),
                       params["wq"].astype(f32).reshape(1, -1))
        else:  # self-query
            kernel = _kernel_self_query
            weights = (params["wk"].T.astype(x.dtype),             # (D, h)
                       params["bk"].astype(f32).reshape(1, -1),
                       params["wq"].T.astype(f32),                  # (D, h), tiny f32 matmul
                       (T * params["bq"]).astype(f32).reshape(1, -1))
        in_specs = [pl.BlockSpec((bt, T, D), lambda b: (b, 0, 0))]
        in_specs += [_const_spec(w.shape, 1) for w in weights]
        return pl.pallas_call(
            kernel,
            out_shape=jax.ShapeDtypeStruct((B, D), x.dtype),
            grid_spec=pltpu.PrefetchScalarGridSpec(
                num_scalar_prefetch=0,
                grid=(nb,),
                in_specs=in_specs,
                out_specs=pl.BlockSpec((bt, D), lambda b: (b, 0)),
            ),
            compiler_params=pltpu.CompilerParams(
                dimension_semantics=("parallel",),
                vmem_limit_bytes=vmem_limit,
            ),
        )(x, *weights)

    # -------- long-T fallback: time-tiled online softmax --------
    nt = pl.cdiv(T, tt)
    if mode == "location":
        kernel = functools.partial(_tiled_location, t_total=T, t_tile=tt)
        inputs = [(params["wq"].astype(f32).reshape(1, D), _const_spec((1, D), 2)),
                  (params["bq"].astype(f32).reshape(1, 1), _const_spec((1, 1), 2))]
    elif mode == "ienco":
        kernel = functools.partial(_tiled_ienco, t_total=T, t_tile=tt)
        wk = params["wk"].T.astype(x.dtype)
        bk = params["bk"].astype(f32).reshape(1, -1)
        wq = params["wq"].astype(f32).reshape(1, -1)
        inputs = [(wk, _const_spec(wk.shape, 2)),
                  (bk, _const_spec(bk.shape, 2)),
                  (wq, _const_spec(wq.shape, 2))]
    else:  # self-query: q is global over T -> precompute per-batch q once in XLA
        kernel = functools.partial(_tiled_self_query, t_total=T, t_tile=tt)
        h = proj_cols
        q_pre = (jnp.sum(x.astype(f32), axis=1) @ params["wq"].T.astype(f32)
                 + T * params["bq"].astype(f32).reshape(1, -1)).reshape(B, 1, h)
        wk = params["wk"].T.astype(x.dtype)
        bk = params["bk"].astype(f32).reshape(1, -1)
        inputs = [(q_pre, pl.BlockSpec((bt, 1, h), lambda b, t: (b, 0, 0))),
                  (wk, _const_spec(wk.shape, 2)),
                  (bk, _const_spec(bk.shape, 2))]

    in_specs = [pl.BlockSpec((bt, tt, D), lambda b, t: (b, t, 0))]
    in_specs += [spec for _, spec in inputs]
    out = pl.pallas_call(
        kernel,
        out_shape=jax.ShapeDtypeStruct((B, 1, D), x.dtype),
        grid_spec=pltpu.PrefetchScalarGridSpec(
            num_scalar_prefetch=0,
            grid=(nb, nt),
            in_specs=in_specs,
            out_specs=pl.BlockSpec((bt, 1, D), lambda b, t: (b, 0, 0)),
            scratch_shapes=[pltpu.VMEM((bt, 1, 1), f32),   # running max
                            pltpu.VMEM((bt, 1, 1), f32),   # running denominator
                            pltpu.VMEM((bt, 1, D), f32)],  # running weighted sum
        ),
        compiler_params=pltpu.CompilerParams(
            dimension_semantics=("parallel", "arbitrary"),
            vmem_limit_bytes=vmem_limit,
        ),
    )(x, *[a for a, _ in inputs])
    return out.reshape(B, D)   # (B,1,D) -> (B,D): metadata-only XLA reshape


# --------------------------------------------------------------------------------------
# params / reference / test
# --------------------------------------------------------------------------------------
def init_params(key, input_dim, mode="location", key_dim=32, h_dim=32):
    """Deterministic init mirroring torch Conv2d default (uniform(+-1/sqrt(fan_in)))."""
    def _uniform(k, shape, fan_in):
        bound = 1.0 / (fan_in ** 0.5)
        return jax.random.uniform(k, shape, minval=-bound, maxval=bound, dtype=jnp.float32)

    ks = jax.random.split(key, 4)
    if mode == "location":
        return {"wq": _uniform(ks[0], (1, input_dim), input_dim),
                "bq": _uniform(ks[1], (1, 1), input_dim)}
    if mode == "ienco":
        return {"wk": _uniform(ks[0], (key_dim, input_dim), input_dim),
                "bk": _uniform(ks[1], (1, key_dim), input_dim),
                "wq": _uniform(ks[2], (1, key_dim), key_dim)}
    if mode == "self-query":
        return {"wk": _uniform(ks[0], (h_dim, input_dim), input_dim),
                "bk": _uniform(ks[1], (1, h_dim), input_dim),
                "wq": _uniform(ks[2], (h_dim, input_dim), input_dim),
                "bq": _uniform(ks[3], (1, h_dim), input_dim)}
    raise ValueError(mode)


def _reference(x, params, mode):
    """Plain-JAX replica of the torch forward."""
    if mode == "location":
        scores = jnp.einsum("btd,d->bt", x, params["wq"][0]) + params["bq"][0, 0]
    elif mode == "ienco":
        k = jnp.tanh(jnp.einsum("btd,kd->btk", x, params["wk"]) + params["bk"][0])
        scores = jnp.einsum("btk,k->bt", k, params["wq"][0])
    else:  # self-query
        k = jnp.einsum("btd,hd->bth", x, params["wk"]) + params["bk"][0]
        q = (jnp.einsum("btd,hd->bth", x, params["wq"]) + params["bq"][0]).sum(axis=1)
        scores = jnp.einsum("bth,bh->bt", k, q)
    distr = jax.nn.softmax(scores, axis=1)
    return jnp.einsum("btd,bt->bd", x, distr)


if __name__ == "__main__":
    key = jax.random.PRNGKey(0)
    kx, kp = jax.random.split(key)

    # small shapes consistent with the module: (batch, time, features)
    B, T, D = 2, 8, 16
    x = jax.random.normal(kx, (B, T, D), dtype=jnp.float32)
    for i, mode in enumerate(("location", "ienco", "self-query")):
        params = init_params(jax.random.fold_in(kp, i), D, mode)
        out = jax.block_until_ready(temporal_attention_pooling(x, params, mode))
        ref = _reference(x, params, mode)
        assert out.shape == (B, D), (mode, out.shape)
        assert jnp.allclose(out, ref, atol=1e-2, rtol=1e-2), \
            f"mismatch mode={mode} err={float(jnp.max(jnp.abs(out - ref)))}"

    # exercise the long-T fallback (time-tiled online softmax), including a ragged
    # last time block (T=40 with a forced 16-step time tile)
    B2, T2, D2 = 4, 40, 16
    x2 = jax.random.normal(jax.random.fold_in(kx, 1), (B2, T2, D2), dtype=jnp.float32)
    for i, mode in enumerate(("location", "ienco", "self-query")):
        params = init_params(jax.random.fold_in(kp, 10 + i), D2, mode)
        out = jax.block_until_ready(
            temporal_attention_pooling(x2, params, mode, tile_override=(B2, 16)))
        ref = _reference(x2, params, mode)
        assert out.shape == (B2, D2), (mode, out.shape)
        assert jnp.allclose(out, ref, atol=1e-2, rtol=1e-2), \
            f"mismatch tiled mode={mode} err={float(jnp.max(jnp.abs(out - ref)))}"

    print("KERNEL_OK")
</pallas_src>

<mosaic_0001>
module attributes {stable_mosaic.version = 11 : i64} {
  func.func @_kernel_location(%arg0: i32, %arg1: memref<2x8x16xf32, #tpu.memory_space<vmem>>, %arg2: memref<1x16xf32, #tpu.memory_space<vmem>>, %arg3: memref<1x1xf32, #tpu.memory_space<vmem>>, %arg4: memref<2x16xf32, #tpu.memory_space<vmem>>) attributes {dimension_semantics = [#tpu.dimension_semantics<parallel>], iteration_bounds = array<i64: 1>, scalar_prefetch = 0 : i64, scratch_operands = 0 : i64, tpu.core_type = #tpu.core_type<tc>, window_params = [{transform_indices = @transform_0, window_bounds = array<i64: 2, 8, 16>}, {pipeline_mode = #tpu.pipeline_mode<synchronous>, transform_indices = @transform_1, window_bounds = array<i64: 1, 16>}, {pipeline_mode = #tpu.pipeline_mode<synchronous>, transform_indices = @transform_2, window_bounds = array<i64: 1, 1>}, {transform_indices = @transform_3, window_bounds = array<i64: 2, 16>}]} {
    %c0 = arith.constant 0 : index
    %c0_0 = arith.constant 0 : index
    %c0_1 = arith.constant 0 : index
    %0 = vector.load %arg1[%c0, %c0_0, %c0_1] : memref<2x8x16xf32, #tpu.memory_space<vmem>>, vector<2x8x16xf32>
    %c0_2 = arith.constant 0 : index
    %c0_3 = arith.constant 0 : index
    %1 = vector.load %arg2[%c0_2, %c0_3] : memref<1x16xf32, #tpu.memory_space<vmem>>, vector<1x16xf32>
    %2 = vector.shape_cast %1 : vector<1x16xf32> to vector<1x1x16xf32>
    %3 = vector.broadcast %2 : vector<1x1x16xf32> to vector<2x8x16xf32>
    %4 = arith.mulf %0, %3 : vector<2x8x16xf32>
    %cst = arith.constant dense<0.000000e+00> : vector<2x8xf32>
    %5 = vector.multi_reduction <add>, %4, %cst [2] : vector<2x8x16xf32> to vector<2x8xf32>
    %6 = vector.shape_cast %5 : vector<2x8xf32> to vector<2x8x1xf32>
    %c0_4 = arith.constant 0 : index
    %c0_5 = arith.constant 0 : index
    %7 = vector.load %arg3[%c0_4, %c0_5] : memref<1x1xf32, #tpu.memory_space<vmem>>, vector<1x1xf32>
    %8 = vector.shape_cast %7 : vector<1x1xf32> to vector<1x1x1xf32>
    %9 = vector.broadcast %8 : vector<1x1x1xf32> to vector<2x8x1xf32>
    %10 = arith.addf %6, %9 : vector<2x8x1xf32>
    %cst_6 = arith.constant dense<0xFF800000> : vector<2x1xf32>
    %11 = vector.multi_reduction <maximumf>, %10, %cst_6 [1] : vector<2x8x1xf32> to vector<2x1xf32>
    %12 = vector.shape_cast %11 : vector<2x1xf32> to vector<2x1x1xf32>
    %13 = vector.broadcast %12 : vector<2x1x1xf32> to vector<2x8x1xf32>
    %14 = arith.subf %10, %13 : vector<2x8x1xf32>
    %15 = math.exp %14 : vector<2x8x1xf32>
    %cst_7 = arith.constant dense<0.000000e+00> : vector<2x1xf32>
    %16 = vector.multi_reduction <add>, %15, %cst_7 [1] : vector<2x8x1xf32> to vector<2x1xf32>
    %17 = vector.shape_cast %16 : vector<2x1xf32> to vector<2x1x1xf32>
    %18 = vector.broadcast %17 : vector<2x1x1xf32> to vector<2x8x1xf32>
    %19 = arith.divf %15, %18 : vector<2x8x1xf32>
    %20 = vector.broadcast %19 : vector<2x8x1xf32> to vector<2x8x16xf32>
    %21 = arith.mulf %0, %20 : vector<2x8x16xf32>
    %cst_8 = arith.constant dense<0.000000e+00> : vector<2x16xf32>
    %22 = vector.multi_reduction <add>, %21, %cst_8 [1] : vector<2x8x16xf32> to vector<2x16xf32>
    %c0_9 = arith.constant 0 : index
    %c0_10 = arith.constant 0 : index
    %23 = vector.load %arg4[%c0_9, %c0_10] : memref<2x16xf32, #tpu.memory_space<vmem>>, vector<2x16xf32>
    tpu.vector_store %arg4[%c0_9, %c0_10], %22 {strides = array<i32>} : memref<2x16xf32, #tpu.memory_space<vmem>>, vector<2x16xf32>,
    return
  }
  func.func @transform_0(%arg0: i32) -> (i32, i32, i32) {
    %c0_i32 = arith.constant 0 : i32
    %c0_i32_0 = arith.constant 0 : i32
    %c0_i32_1 = arith.constant 0 : i32
    return %arg0, %c0_i32, %c0_i32_0 : i32, i32, i32
  }
  func.func @transform_1(%arg0: i32) -> (i32, i32) {
    %c0_i32 = arith.constant 0 : i32
    %c0_i32_0 = arith.constant 0 : i32
    %c0_i32_1 = arith.constant 0 : i32
    return %c0_i32, %c0_i32_0 : i32, i32
  }
  func.func @transform_2(%arg0: i32) -> (i32, i32) {
    %c0_i32 = arith.constant 0 : i32
    %c0_i32_0 = arith.constant 0 : i32
    %c0_i32_1 = arith.constant 0 : i32
    return %c0_i32, %c0_i32_0 : i32, i32
  }
  func.func @transform_3(%arg0: i32) -> (i32, i32) {
    %c0_i32 = arith.constant 0 : i32
    %c0_i32_0 = arith.constant 0 : i32
    return %arg0, %c0_i32 : i32, i32
  }
}

</mosaic_0001>

<bundles_post_ra>
// kernel: tpu_custom_call.1
= control target key start
LH: loop header
LB: loop body
LE: loop exit
PB: predicated region body
PF: predicated region fallthrough
CT: control target
= control target key end

     0   :  { %s281_s0 = inlined_call_operand.hbm [shape: f32[2,8,16], index: 0, kind: input, shape index: {}]   ;;  %s282_s1 = inlined_call_operand.vmem [shape: f32[1,16], index: 1, kind: input, shape index: {}]   ;;  %s283_s2 = inlined_call_operand.<no memory space> [shape: f32[1,1], index: 2, kind: input, shape index: {}]   ;;  %s284_s3 = inlined_call_operand.hbm [shape: f32[2,16], index: 3, kind: output, shape index: {}]  }
   0x1   :  { %v8_v0 = vstv %s283_s2 }
   0x2   :  { %9 = vst [vmem:[#allocation2] sm:$0x1] %v8_v0 }
   0x3   :  { %10 = vsyncpa [#allocation4], 0 }
   0x4   :  { %11 = vsyncpa [#allocation5], 0  ;;  %s210_s14 = smov [#allocation3]   ;;  %s162_s18 = scalar_lea.hbm %s281_s0, 256 }
   0x5   :  { %s17_s15 = sshll.u32 %s210_s14, 4  ;;  %p163_p0 = scmp.ne.s32.totalorder %s281_s0, %s162_s18  ;;  %s18_s15 = int_to_ptr.vmem [resolvable:$true] %s17_s15 }
   0x6   :  { %p166_p1 = scmp.lt.u32.totalorder %s162_s18, %s281_s0 }
   0x8   :  { %p168_p2 = pnand %p166_p1, %p163_p0 }
   0xa   :  { %171 = shalt.err (!%p168_p2)
}
   0xb   :  { %s172_s2 = scalar_lea.vmem %s18_s15, 256  ;;  %p177_p4 = scmp.lt.s32.totalorder %s18_s15, %s18_s15 }
   0xc   :  { %p173_p3 = scmp.ne.s32.totalorder %s18_s15, %s172_s2  ;;  %p178_p5 = scmp.lt.s32.totalorder %s172_s2, %s172_s2 }
   0xe   :  { %p179_p6 = por %p178_p5, %p177_p4 }
  0x10   :  { %p180_p7 = pnand %p179_p6, %p173_p3 }
  0x12   :  { %183 = shalt.err (!%p180_p7)
}
  0x13   :  { %s211_s23 = smov 128   ;;  %s212_s24 = smov 8  }
  0x14   :  { %23 = dma.hbm_to_vmem [thread:$0]  %s281_s0, 256, %s18_s15, [#allocation4], %s211_s23, %s211_s23, %s212_s24  }
  0x15   :  { %206 = dma.done.wait [#allocation4], 256  }
  0x16   :  { %207 = vsyncadd [#allocation4], 4294967040  ;;  %v250_v1 = vld [vmem:[#allocation3] sm:$0xff]  ;;  %v145_v2 = vld [vmem:[%s282_s1] ss:$0 sm:$0xff]  ;;  %vm42_vm0 = vcmask 130048  }
  0x17   :  { %v255_v3 = vld [vmem:[#allocation3 + $0x8] sm:$0xff]  ;;  %v40_v4 = vmul.f32 %v145_v2, %v250_v1  ;;  %v213_v8 = vmov 0   ;;  %v146_v9 = vld [vmem:[#allocation2] ss:$0 sm:$0xff]  ;;  %vm58_vm1 = vcmask 7168   ;;  %s214_s0 = smov [#allocation6]  }
  0x18   :  { %v41_v5 = vmul.f32 %v145_v2, %v255_v3  ;;  %152 = vset.pattern.permute.xlu1 %v213_v8  ;;  %153 = vset.pattern.permute.xlu0 %v213_v8  ;;  %s136_s1 = sshll.u32 %s214_s0, 4  ;;  %vm125_vm2 = vcmask 1041409   ;;  %vm128_vm3 = vcmask 123904   ;;  %s137_s1 = int_to_ptr.vmem [resolvable:$true] %s136_s1 }
  0x19   :  { %v43_v6 = vsel %vm42_vm0, %v40_v4, 0.0  ;;  %s184_s29 = scalar_lea.vmem %s137_s1, 32  ;;  %p189_p9 = scmp.lt.s32.totalorder %s137_s1, %s137_s1 }
  0x1a   :  { %44 = vadd.xlane.f32.xlu0 %v43_v6  ;;  %v46_v7 = vsel %vm42_vm0, %v41_v5, 0.0  ;;  %p185_p8 = scmp.ne.s32.totalorder %s137_s1, %s184_s29  ;;  %p190_p10 = scmp.lt.s32.totalorder %s184_s29, %s184_s29 }
  0x1c   :  { %p191_p11 = por %p190_p10, %p189_p9 }
  0x1e   :  { %47 = vadd.xlane.f32.xlu0 %v46_v7  ;;  %p192_p12 = pnand %p191_p11, %p185_p8 }
  0xa7   :  { %v45_v10 = vpop.xlane.xlu0 %44 }
  0xa8   :  { %v56_v11 = vadd.f32 %v146_v9, %v45_v10 }
  0xaa   :  { %v59_v12 = vsel %vm58_vm1, %v56_v11, -inf }
  0xab   :  { %v60_v13 = vrot.slane %v59_v12, 4  ;;  %v48_v14 = vpop.xlane.xlu0 %47 }
  0xac   :  { %v57_v15 = vadd.f32 %v146_v9, %v48_v14 }
  0xad   :  { %v61_v16 = vmax.f32 %v59_v12, %v60_v13 }
  0xae   :  { %v66_v17 = vsel %vm58_vm1, %v57_v15, -inf }
  0xaf   :  { %v62_v18 = vrot.slane %v61_v16, 2  ;;  %v67_v19 = vrot.slane %v66_v17, 4 }
  0xb1   :  { %v63_v20 = vmax.f32 %v61_v16, %v62_v18  ;;  %v68_v21 = vmax.f32 %v66_v17, %v67_v19 }
  0xb3   :  { %v64_v22 = vrot.slane %v63_v20, 1  ;;  %v69_v23 = vrot.slane %v68_v21, 2 }
  0xb5   :  { %v65_v24 = vmax.f32 %v63_v20, %v64_v22  ;;  %v70_v25 = vmax.f32 %v68_v21, %v69_v23 }
  0xb7   :  { %v73_v26 = vsub.f32 %v56_v11, %v65_v24  ;;  %v71_v27 = vrot.slane %v70_v25, 1 }
  0xb9   :  { %v75_v28 = vmul.f32 1.442695, %v73_v26  ;;  %v72_v29 = vmax.f32 %v70_v25, %v71_v27 }
  0xbb   :  { %154 = vpow2.f32 %v75_v28  ;;  %v74_v30 = vsub.f32 %v57_v15, %v72_v29 }
  0xbd   :  { %v77_v31 = vmul.f32 1.442695, %v74_v30 }
  0xbf   :  { %156 = vpow2.f32 %v77_v31 }
  0xc5   :  { %v155_v32 = vpop.eup %154 }
  0xc6   :  { %v79_v33 = vsel %vm58_vm1, %v155_v32, 0.0 }
  0xc7   :  { %v80_v34 = vrot.slane %v79_v33, 4 }
  0xc9   :  { %v157_v35 = vpop.eup %156  ;;  %v81_v36 = vadd.f32 %v80_v34, %v79_v33 }
  0xca   :  { %v86_v37 = vsel %vm58_vm1, %v157_v35, 0.0 }
  0xcb   :  { %v82_v38 = vrot.slane %v81_v36, 2  ;;  %v87_v39 = vrot.slane %v86_v37, 4 }
  0xcd   :  { %v83_v40 = vadd.f32 %v82_v38, %v81_v36  ;;  %v88_v41 = vadd.f32 %v87_v39, %v86_v37 }
  0xcf   :  { %v89_v42 = vrot.slane %v88_v41, 2  ;;  %v84_v43 = vrot.slane %v83_v40, 1 }
  0xd1   :  { %v85_v44 = vadd.f32 %v84_v43, %v83_v40  ;;  %v90_v45 = vadd.f32 %v89_v42, %v88_v41 }
  0xd3   :  { %158 = vrcp.f32 %v85_v44  ;;  %v91_v46 = vrot.slane %v90_v45, 1 }
  0xd5   :  { %v92_v47 = vadd.f32 %v91_v46, %v90_v45 }
  0xd7   :  { %160 = vrcp.f32 %v92_v47 }
  0xdd   :  { %v159_v48 = vpop.eup %158 }
  0xde   :  { %v94_v49 = vmul.f32 %v159_v48, %v155_v32 }
  0xe0   :  { %99 = vperm.xlu1 %152, %v94_v49  }
  0xe1   :  { %v161_v50 = vpop.eup %160 }
  0xe2   :  { %v96_v51 = vmul.f32 %v161_v50, %v157_v35 }
  0xe4   :  { %104 = vperm.xlu1 %152, %v96_v51  }
 0x15f   :  { %v100_v52 = vpop.permute.xlu1 %99 }
 0x160   :  { %v107_v53 = vmul.f32 %v100_v52, %v250_v1 }
 0x162   :  { %v109_v54 = vsel %vm42_vm0, %v107_v53, 0.0 }
 0x163   :  { %v110_v55 = vrot.slane %v109_v54, 4  ;;  %v105_v56 = vpop.permute.xlu1 %104 }
 0x164   :  { %v108_v57 = vmul.f32 %v105_v56, %v255_v3 }
 0x165   :  { %v111_v58 = vadd.f32 %v110_v55, %v109_v54 }
 0x166   :  { %v116_v59 = vsel %vm42_vm0, %v108_v57, 0.0 }
 0x167   :  { %v112_v60 = vrot.slane %v111_v58, 2  ;;  %v117_v61 = vrot.slane %v116_v59, 4 }
 0x169   :  { %v113_v62 = vadd.f32 %v112_v60, %v111_v58  ;;  %v118_v63 = vadd.f32 %v117_v61, %v116_v59 }
 0x16b   :  { %v119_v0 = vrot.slane %v118_v63, 2  ;;  %v114_v2 = vrot.slane %v113_v62, 1 }
 0x16d   :  { %v120_v4 = vadd.f32 %v119_v0, %v118_v63  ;;  %v115_v1 = vadd.f32 %v114_v2, %v113_v62 }
 0x16f   :  { %v121_v5 = vrot.slane %v120_v4, 1 }
 0x171   :  { %v122_v6 = vadd.f32 %v121_v5, %v120_v4 }
 0x173   :  { %v126_v7 = vsel %vm125_vm2, %v122_v6, %v115_v1 }
 0x174   :  { %129 = vst.msk [vmem:[#allocation6] sm:$0x3] %vm128_vm3, %v126_v7 }
 0x175   :  { %195 = shalt.err (!%p192_p12)
}
 0x176   :  { %s196_s5 = scalar_lea.hbm %s284_s3, 32 }
 0x177   :  { %p197_p13 = scmp.ne.s32.totalorder %s284_s3, %s196_s5  ;;  %p200_p0 = scmp.lt.u32.totalorder %s196_s5, %s284_s3 }
 0x179   :  { %p202_p1 = pnand %p200_p0, %p197_p13 }
 0x17b   :  { %205 = shalt.err (!%p202_p1)
}
 0x17c   :  { %139 = dma.vmem_to_hbm [thread:$0]  %s137_s1, 32, %s284_s3, [#allocation5]  }
 0x17d   :  { %208 = dma.done.wait [#allocation5], 32  }
 0x17e   :  { %209 = vsyncadd [#allocation5], 4294967264 }
 0x17f   :  { %143 = vsyncpa [#allocation4], 1 }
 0x180   :  { %144 = vsyncpa [#allocation5], 1 }

</bundles_post_ra>
